<compile_context>
chip_gen: v7x
topology: tpu7x:2x2x1
jax: 0.10.0
libtpu: 0.0.40
codegen_flags: <defaults>
</compile_context>

<pallas_src>
import jax
import jax.numpy as jnp
from jax.experimental import pallas as pl
from jax.experimental.pallas import tpu as pltpu


# --------------------------------------------------------------- helpers ----
def _round_up(x, m):
    return ((x + m - 1) // m) * m


def _pick_tile(dim, candidates, align):
    """Pad `dim` to a multiple of `align`; pick the largest candidate tile
    that evenly divides the padded extent (so real aligned shapes never pad)."""
    padded = _round_up(dim, align)
    for cand in candidates:
        if padded % cand == 0:
            return cand, padded
    return align, padded  # unreachable when `align` is in candidates


# ------------------------------------------------------------------ kernel ---
def _bmm_kernel(x_ref, w_ref, o_ref, acc_ref):
    # x_ref: (tm, tk)  w_ref: (tk, tn)  o_ref: (tm, tn)  acc_ref: (tm, tn) f32
    # (the TP grid axis is squeezed out of the block shapes)
    k = pl.program_id(3)

    @pl.when(k == 0)
    def _():
        acc_ref[...] = jnp.zeros_like(acc_ref)

    # Cast the streamed activation tile to the (bf16) weight dtype so the MXU
    # runs a native low-precision matmul; accumulate in f32 VMEM scratch.
    acc_ref[...] += jnp.dot(
        x_ref[...].astype(w_ref.dtype), w_ref[...],
        preferred_element_type=jnp.float32,
    )

    @pl.when(k == pl.num_programs(3) - 1)
    def _():
        o_ref[...] = acc_ref[...].astype(o_ref.dtype)


def pallas_bmm(x, w, *, out_dtype=None):
    """Tiled batched matmul: x (TP, M, D) @ w (TP, D, K) -> (TP, M, K)."""
    TP, M, D = x.shape
    TPw, Dw, K = w.shape
    assert TP == TPw and D == Dw
    out_dtype = jnp.dtype(out_dtype or x.dtype)

    # ---- tile selection --------------------------------------------------
    # Last two dims of every block must be (8,128)-aligned; K is padded to
    # >=128 so the output stores are lane-dense (unmasked vst) and the MXU
    # result tile is fully used.  512/256 tile edges feed the 2x256x256 MXUs
    # on v6e/v7x; total per-step VMEM (double-buffered) stays a few MiB, well
    # under the scoped default on every generation (incl. v7x's 64 MiB).
    tm = min(512, _round_up(M, 8))
    m_pad = _round_up(M, tm)
    tk, d_pad = _pick_tile(D, (512, 256, 128), 128)
    tn, k_pad = _pick_tile(K, (256, 128), 128)

    # ---- zero-pad to tile-aligned shapes (no-op for aligned real shapes) ---
    if (m_pad, d_pad) != (M, D):
        x = jnp.pad(x, ((0, 0), (0, m_pad - M), (0, d_pad - D)))
    if (d_pad, k_pad) != (D, K):
        w = jnp.pad(w, ((0, 0), (0, d_pad - D), (0, k_pad - K)))

    grid = (TP, m_pad // tm, k_pad // tn, d_pad // tk)  # reduction axis last

    cost = pl.CostEstimate(
        flops=2 * TP * m_pad * d_pad * k_pad,
        transcendentals=0,
        bytes_accessed=int(
            x.size * x.dtype.itemsize
            + w.size * w.dtype.itemsize
            + TP * m_pad * k_pad * out_dtype.itemsize
        ),
    )

    out = pl.pallas_call(
        _bmm_kernel,
        out_shape=jax.ShapeDtypeStruct((TP, m_pad, k_pad), out_dtype),
        grid=grid,
        in_specs=[
            pl.BlockSpec((pl.Squeezed(), tm, tk), lambda t, i, j, k: (t, i, k)),
            pl.BlockSpec((pl.Squeezed(), tk, tn), lambda t, i, j, k: (t, k, j)),
        ],
        out_specs=pl.BlockSpec((pl.Squeezed(), tm, tn), lambda t, i, j, k: (t, i, j)),
        scratch_shapes=[pltpu.VMEM((tm, tn), jnp.float32)],
        compiler_params=pltpu.CompilerParams(
            # TP / M-tile / N-tile axes are independent -> megacore-shardable
            # (v7x); only the D reduction axis must stay sequential.
            dimension_semantics=("parallel", "parallel", "parallel", "arbitrary"),
        ),
        cost_estimate=cost,
    )(x, w)

    if (m_pad, k_pad) != (M, K):
        out = out[:, :M, :K]
    return out


# ---------------------------------------------------------------- module -----
class ProjectionModule:
    """JAX/Pallas port of espace.projection.projection_module.ProjectionModule.

    `precision` plays the role of espace_args.precision (dtype of the stored,
    truncated projection matrix); bf16 is the recommended TPU default.  Passing
    bf16 activations additionally halves HBM traffic for the streamed operand.
    """

    def __init__(self, module_name, projection_matrix, scores, num_components,
                 projection_method="eigen", precision=jnp.bfloat16):
        self.module_name = module_name
        self.num_components = num_components
        self.projection_method = projection_method
        self.precision = precision
        self._initialize_buffers(projection_matrix, scores)

    def _initialize_buffers(self, loaded_projection_matrix, scores):
        if "eigen" in self.projection_method:
            if self.projection_method == "absolute_eigen":
                sorted_idx = jnp.argsort(-jnp.abs(scores), axis=-1)  # descending
            else:  # 'eigen'
                sorted_idx = jnp.argsort(-scores, axis=-1)           # descending
        if loaded_projection_matrix.ndim == 3:
            # TP-merged case: loaded (TP, Dp, E), scores (TP, E)
            self.TP_merging = True
            truncated_idx = sorted_idx[:, : self.num_components]      # (TP, K)
            gather_idx = jnp.repeat(
                truncated_idx[:, None, :], loaded_projection_matrix.shape[1], axis=1
            )                                                         # (TP, Dp, K)
            self.projection_matrix = jnp.take_along_axis(
                loaded_projection_matrix, gather_idx, axis=2
            ).astype(self.precision)                                  # (TP, Dp, K)
        else:
            # plain case: loaded (D, E), scores (E,)
            self.TP_merging = False
            truncated_idx = sorted_idx[: self.num_components]
            self.projection_matrix = loaded_projection_matrix[:, truncated_idx].astype(
                self.precision
            )                                                         # (D, K)

    def __call__(self, x):
        if self.TP_merging:
            TP, Dp, K = self.projection_matrix.shape
            orig_shape = x.shape
            new_shape = tuple(orig_shape[:-1]) + (TP * K,)
            # --- TP_merged_forward semantics (pure row-major reshapes + bmm) ---
            matricized = x.reshape(-1, orig_shape[-1])                # (M, D)
            M, D = matricized.shape
            reshaped = matricized.reshape(TP, M, D // TP)             # (TP, M, Dp)
            stack = pallas_bmm(reshaped, self.projection_matrix,
                               out_dtype=x.dtype)                     # (TP, M, K)
            matricized_proj = stack.reshape(M, TP * K)                # (M, TP*K)
            return matricized_proj.reshape(new_shape)
        else:
            D, K = self.projection_matrix.shape
            orig_shape = x.shape
            matricized = x.reshape(-1, D)                             # (M, D)
            out = pallas_bmm(matricized[None], self.projection_matrix[None],
                             out_dtype=x.dtype)[0]
            return out.reshape(tuple(orig_shape[:-1]) + (K,))


# ------------------------------------------------------------------- main ----
if __name__ == "__main__":
    key = jax.random.PRNGKey(0)
    k_x, k_p3, k_s2, k_p2, k_s1 = jax.random.split(key, 5)

    # Small shapes: batch=2, seq=8, hidden=32, TP=2 (per-TP hidden = 16), K=8.
    B, S, D = 2, 8, 32
    TP, E = 2, 16
    num_components = 8

    x = jax.random.normal(k_x, (B, S, D), dtype=jnp.float32)
    # bf16-rounded image of x, used only to build matching references.
    x_bf = x.astype(jnp.bfloat16).astype(jnp.float32)

    # ---- TP-merged variant: loaded projection (TP, D//TP, E), scores (TP, E)
    loaded_proj_3d = jax.random.normal(k_p3, (TP, D // TP, E), dtype=jnp.float32)
    scores_2d = jax.random.normal(k_s2, (TP, E), dtype=jnp.float32)
    mod_tp = ProjectionModule("tp_merged", loaded_proj_3d, scores_2d, num_components)
    out_tp = jax.block_until_ready(mod_tp(x))
    assert out_tp.shape == (B, S, TP * num_components), out_tp.shape

    # reference (pure JAX, same reshape semantics, same bf16 operand rounding)
    mat = x_bf.reshape(-1, D)
    w_tp = mod_tp.projection_matrix.astype(jnp.float32)
    ref_stack = jnp.einsum(
        "tmd,tdk->tmk", mat.reshape(TP, mat.shape[0], D // TP), w_tp
    )
    ref_tp = ref_stack.reshape(mat.shape[0], TP * num_components).reshape(
        B, S, TP * num_components
    )
    assert jnp.allclose(out_tp, ref_tp, rtol=2e-2, atol=2e-2), (
        float(jnp.max(jnp.abs(out_tp - ref_tp)))
    )

    # ---- plain (non-TP-merged) variant: loaded projection (D, E2), scores (E2,)
    E2 = 32
    loaded_proj_2d = jax.random.normal(k_p2, (D, E2), dtype=jnp.float32)
    scores_1d = jax.random.normal(k_s1, (E2,), dtype=jnp.float32)
    mod_plain = ProjectionModule("plain", loaded_proj_2d, scores_1d, num_components)
    out_plain = jax.block_until_ready(mod_plain(x))
    assert out_plain.shape == (B, S, num_components), out_plain.shape
    ref_plain = x_bf @ mod_plain.projection_matrix.astype(jnp.float32)
    assert jnp.allclose(out_plain, ref_plain, rtol=2e-2, atol=2e-2), (
        float(jnp.max(jnp.abs(out_plain - ref_plain)))
    )

    print("KERNEL_OK")
</pallas_src>

<mosaic_0001>
module attributes {stable_mosaic.version = 11 : i64} {
  func.func @_bmm_kernel(%arg0: i32, %arg1: i32, %arg2: i32, %arg3: i32, %arg4: memref<1x16x128xf32, #tpu.memory_space<vmem>>, %arg5: memref<1x128x128xbf16, #tpu.memory_space<vmem>>, %arg6: memref<1x16x128xf32, #tpu.memory_space<vmem>>, %arg7: memref<16x128xf32, #tpu.memory_space<vmem>>) attributes {dimension_semantics = [#tpu.dimension_semantics<parallel>, #tpu.dimension_semantics<parallel>, #tpu.dimension_semantics<parallel>, #tpu.dimension_semantics<arbitrary>], iteration_bounds = array<i64: 2, 1, 1, 1>, scalar_prefetch = 0 : i64, scratch_operands = 1 : i64, tpu.core_type = #tpu.core_type<tc>, window_params = [{transform_indices = @transform_0, window_bounds = array<i64: 1, 16, 128>}, {transform_indices = @transform_1, window_bounds = array<i64: 1, 128, 128>}, {transform_indices = @transform_2, window_bounds = array<i64: 1, 16, 128>}]} {
    %c0_i32 = arith.constant 0 : i32
    %0 = arith.cmpi eq, %arg3, %c0_i32 : i32
    %1 = arith.extui %0 : i1 to i32
    %c0_i32_0 = arith.constant 0 : i32
    %2 = arith.cmpi ne, %1, %c0_i32_0 : i32
    scf.if %2 {
      %cst_12 = arith.constant 0.000000e+00 : f32
      %15 = vector.broadcast %cst_12 : f32 to vector<16x128xf32>
      %c0_13 = arith.constant 0 : index
      %c0_14 = arith.constant 0 : index
      %16 = vector.load %arg7[%c0_13, %c0_14] : memref<16x128xf32, #tpu.memory_space<vmem>>, vector<16x128xf32>
      tpu.vector_store %arg7[%c0_13, %c0_14], %15 {strides = array<i32>} : memref<16x128xf32, #tpu.memory_space<vmem>>, vector<16x128xf32>,
    } else {
    }
    %c0 = arith.constant 0 : index
    %c0_1 = arith.constant 0 : index
    %3 = vector.load %arg7[%c0, %c0_1] : memref<16x128xf32, #tpu.memory_space<vmem>>, vector<16x128xf32>
    %c0_2 = arith.constant 0 : index
    %c0_3 = arith.constant 0 : index
    %c0_4 = arith.constant 0 : index
    %4 = vector.load %arg4[%c0_2, %c0_3, %c0_4] : memref<1x16x128xf32, #tpu.memory_space<vmem>>, vector<1x16x128xf32>
    %5 = vector.shape_cast %4 : vector<1x16x128xf32> to vector<16x128xf32>
    %6 = arith.truncf %5 : vector<16x128xf32> to vector<16x128xbf16>
    %c0_5 = arith.constant 0 : index
    %c0_6 = arith.constant 0 : index
    %c0_7 = arith.constant 0 : index
    %7 = vector.load %arg5[%c0_5, %c0_6, %c0_7] : memref<1x128x128xbf16, #tpu.memory_space<vmem>>, vector<1x128x128xbf16>
    %8 = vector.shape_cast %7 : vector<1x128x128xbf16> to vector<128x128xbf16>
    %cst = arith.constant dense<0.000000e+00> : vector<16x128xf32>
    %9 = tpu.matmul %6, %8, %cst {dimension_numbers = #tpu.dot_dimension_numbers<[1], [0], [0], [1], [0, 0, 1, 1], [], []>} : vector<16x128xbf16>, vector<128x128xbf16>, vector<16x128xf32> -> vector<16x128xf32>
    %10 = arith.addf %3, %9 : vector<16x128xf32>
    %c0_8 = arith.constant 0 : index
    %c0_9 = arith.constant 0 : index
    %11 = vector.load %arg7[%c0_8, %c0_9] : memref<16x128xf32, #tpu.memory_space<vmem>>, vector<16x128xf32>
    tpu.vector_store %arg7[%c0_8, %c0_9], %10 {strides = array<i32>} : memref<16x128xf32, #tpu.memory_space<vmem>>, vector<16x128xf32>,
    %c0_i32_10 = arith.constant 0 : i32
    %12 = arith.cmpi eq, %arg3, %c0_i32_10 : i32
    %13 = arith.extui %12 : i1 to i32
    %c0_i32_11 = arith.constant 0 : i32
    %14 = arith.cmpi ne, %13, %c0_i32_11 : i32
    scf.if %14 {
      %c0_12 = arith.constant 0 : index
      %c0_13 = arith.constant 0 : index
      %15 = vector.load %arg7[%c0_12, %c0_13] : memref<16x128xf32, #tpu.memory_space<vmem>>, vector<16x128xf32>
      %c0_14 = arith.constant 0 : index
      %c0_15 = arith.constant 0 : index
      %c0_16 = arith.constant 0 : index
      %16 = vector.load %arg6[%c0_14, %c0_15, %c0_16] : memref<1x16x128xf32, #tpu.memory_space<vmem>>, vector<1x16x128xf32>
      %17 = vector.shape_cast %16 : vector<1x16x128xf32> to vector<16x128xf32>
      %18 = vector.shape_cast %15 : vector<16x128xf32> to vector<1x16x128xf32>
      tpu.vector_store %arg6[%c0_14, %c0_15, %c0_16], %18 {strides = array<i32>} : memref<1x16x128xf32, #tpu.memory_space<vmem>>, vector<1x16x128xf32>,
    } else {
    }
    return
  }
  func.func @transform_0(%arg0: i32, %arg1: i32, %arg2: i32, %arg3: i32) -> (i32, i32, i32) {
    %c0_i32 = arith.constant 0 : i32
    return %arg0, %arg1, %arg3 : i32, i32, i32
  }
  func.func @transform_1(%arg0: i32, %arg1: i32, %arg2: i32, %arg3: i32) -> (i32, i32, i32) {
    %c0_i32 = arith.constant 0 : i32
    return %arg0, %arg3, %arg2 : i32, i32, i32
  }
  func.func @transform_2(%arg0: i32, %arg1: i32, %arg2: i32, %arg3: i32) -> (i32, i32, i32) {
    %c0_i32 = arith.constant 0 : i32
    return %arg0, %arg1, %arg2 : i32, i32, i32
  }
}

</mosaic_0001>

<bundles_post_ra>
// kernel: tpu_custom_call.1
= control target key start
LH: loop header
LB: loop body
LE: loop exit
PB: predicated region body
PF: predicated region fallthrough
CT: control target
= control target key end

     0   :  { %7 = vsyncpa [#allocation4], 0  ;;  %s1065_s0 = inlined_call_operand.hbm [shape: f32[2,16,128], index: 0, kind: input, shape index: {}]   ;;  %s1066_s1 = inlined_call_operand.hbm [shape: bf16[2,128,128], index: 1, kind: input, shape index: {}]   ;;  %s1067_s2 = inlined_call_operand.hbm [shape: f32[2,16,128], index: 2, kind: output, shape index: {}]  }
   0x1   :  { %9 = vsyncpa [#allocation4 + $0x1], 0 }
   0x2   :  { %10 = vsyncpa [#allocation7], 0 }
   0x3   :  { %12 = vsyncpa [#allocation7 + $0x1], 0 }
   0x4   :  { %13 = vsyncpa [#allocation5], 0 }
   0x5   :  { %15 = vsyncpa [#allocation5 + $0x1], 0  ;;  %s832_s9 = smov 0   ;;  %s834_s10 = smov 0  }
   0x6   :  { %s836_s11 = smov 0   ;;  %s838_s12 = smov 0  }
   0x7   :  { %s840_s13 = smov 0   ;;  %s842_s14 = smov 0  }
   0x8 LB: > { %s516_s15 = sadd.s32 4294967295, %s804_s14   ;;  %s517_s16 = sadd.s32 4294967294, %s804_s14   ;;  %s804_s14 = sphi %s842_s14, %s21_s14   ;;  %s800_s13 = sphi %s840_s13, %s1085_s13   ;;  %s796_s12 = sphi %s838_s12, %s1084_s12   ;;  %s792_s11 = sphi %s836_s11, %s1083_s11   ;;  %s788_s10 = sphi %s834_s10, %s1082_s10   ;;  %s784_s9 = sphi %s832_s9, %s1081_s9  }
   0x9   : > { %s47_s17 = sadd.s32 1, %s800_s13  ;;  %s58_s18 = sadd.s32 1, %s792_s11 }
   0xa   : > { %p49_p0 = scmp.ge.s32.totalorder %s47_s17, 2  ;;  %p65_p1 = scmp.ne.s32.totalorder %s792_s11, %s788_s10 }
   0xb   : > { %p66_p2 = scmp.eq.s32.totalorder %s804_s14, 0  ;;  %p71_p3 = scmp.ne.s32.totalorder %s788_s10, %s784_s9 }
   0xc   : > { %s1087_s17 = smov (%p49_p0, %s47_s17), 0  ;;  %p72_p5 = scmp.eq.s32.totalorder %s516_s15, 0 }
   0xd   : > { %p873_p4 = por %p66_p2, %p65_p1  ;;  %s51_s20 = ssub.s32 %s800_s13, %s1087_s17 }
   0xe   : > { %p129_p6 = scmp.eq.s32.totalorder %s516_s15, 1  ;;  %p56_p7 = scmp.eq.s32.totalorder %s51_s20, 0 }
   0xf   : > { %p879_p8 = por %p72_p5, %p71_p3  ;;  %p135_p10 = scmp.eq.s32.totalorder %s517_s16, 1 }
  0x10   : > { %p883_p9 = por %p129_p6, %p65_p1  ;;  %p592_p13 = scmp.lt.s32.totalorder %s804_s14, 2 }
  0x11   : > { %s1071_s21 = scalar_select %p879_p8, 1, 0 }
  0x12   : > { %s1072_s22 = scalar_select %p883_p9, 1, 0 }
  0x13   : > { %s888_s23 = scalar_select %p56_p7, %s792_s11, %s58_s18  }
  0x14   : > { %p890_p11 = por %p135_p10, %p71_p3  ;;  %s897_s25 = sand.u32 1, %s792_s11  }
  0x15   : > { %s520_s26 = sshll.u32 %s897_s25, 4  ;;  %s543_s27 = sshll.u32 %s800_s13, 8 }
  0x16   : > { %s1073_s24 = scalar_select %p890_p11, 1, 0 }
  0x17   : > { %s904_s30 = scalar_lea.hbm %s1065_s0, %s543_s27  ;;  %s159_s3 = scalar_lea.vmem [#allocation3], %s520_s26 }
  0x18   : > { %s169_s4 = sshll.u32 %s159_s3, 4  ;;  %p910_p0 = pnand %p592_p13, %p873_p4  ;;  %s906_s4 = int_to_ptr.vmem [resolvable:$true] %s169_s4 }
  0x19   : > { %s156_s6 = scalar_lea.sflag [#allocation4], %s897_s25  ;;  %s658_s7 = scalar_lea.hbm %s904_s30, 256 }
  0x1a   : > { %p659_p2 = scmp.ne.s32.totalorder %s904_s30, %s658_s7  ;;  %p660_p3 = pneg %p910_p0 }
  0x1b   : > { %s663_s16 = scalar_lea.hbm %s1065_s0, 512  ;;  %p664_p4 = scmp.lt.u32.totalorder %s904_s30, %s1065_s0 }
  0x1c   : > { %p661_p5 = pnand %p660_p3, %p659_p2  ;;  %p665_p7 = scmp.lt.u32.totalorder %s663_s16, %s658_s7 }
  0x1d   : > { %p667_p13 = scmp.lt.u32.totalorder %s658_s7, %s904_s30 }
  0x1e   : > { %p662_p6 = pneg %p661_p5  ;;  %p666_p10 = por %p665_p7, %p664_p4 }
  0x20   : > { %p668_p12 = por %p667_p13, %p666_p10 }
  0x22   : > { %p669_p1 = pnand %p668_p12, %p662_p6 }
  0x24   : > { %672 = shalt.err (!%p669_p1)
}
  0x25   : > { %s673_s20 = scalar_lea.vmem %s906_s4, 256  ;;  %s806_s26 = smov [#allocation3]  }
  0x26   : > { %p674_p2 = scmp.ne.s32.totalorder %s906_s4, %s673_s20  ;;  %s678_s27 = sshll.u32 %s806_s26, 4  ;;  %s679_s27 = int_to_ptr.vmem [resolvable:$false] %s678_s27 }
  0x27   : > { %s680_s28 = scalar_lea.vmem %s679_s27, 512  ;;  %p681_p9 = scmp.lt.s32.totalorder %s906_s4, %s679_s27 }
  0x28   : > { %p676_p5 = pnand %p674_p2, %p660_p3  ;;  %p682_p4 = scmp.lt.s32.totalorder %s680_s28, %s673_s20 }
  0x2a   : > { %p677_p11 = pneg %p676_p5  ;;  %p683_p7 = por %p682_p4, %p681_p9 }
  0x2c   : > { %p684_p10 = pnand %p683_p7, %p677_p11 }
  0x2e   : > { %687 = shalt.err (!%p684_p10)
}
  0x2f   : > { %s807_s29 = smov 128   ;;  %s808_s3 = smov 8  }
  0x30   : > { %584 = dma.hbm_to_vmem [thread:$0]  (!%p910_p0), %s904_s30, 256, %s906_s4, %s156_s6, %s807_s29, %s807_s29, %s808_s3  }
  0x31   : > { %p201_p12 = scmp.lt.s32.totalorder %s804_s14, 3  ;;  %s523_s7 = sshll.u32 %s897_s25, 6 }
  0x32   : > { %s544_s8 = sshll.u32 %s800_s13, 10  ;;  %p1075_p9 = scmp.ge.s32.totalorder %s804_s14, 1 }
  0x33   : > { %s955_s19 = scalar_lea.hbm %s1066_s1, %s544_s8  ;;  %s183_s20 = scalar_lea.vmem [#allocation6], %s523_s7 }
  0x34   : > { %p948_p11 = pnand %p1075_p9, %p201_p12  ;;  %s193_s26 = sshll.u32 %s183_s20, 4  ;;  %s957_s26 = int_to_ptr.vmem [resolvable:$true] %s193_s26 }
  0x35   : > { %s180_s30 = scalar_lea.sflag [#allocation7], %s897_s25  ;;  %s688_s4 = scalar_lea.hbm %s955_s19, 1024 }
  0x36   : > { %p689_p1 = scmp.ne.s32.totalorder %s955_s19, %s688_s4  ;;  %s693_s28 = scalar_lea.hbm %s1066_s1, 2048 }
  0x37   : > { %p694_p2 = scmp.lt.u32.totalorder %s955_s19, %s1066_s1  ;;  %p695_p5 = scmp.lt.u32.totalorder %s693_s28, %s688_s4 }
  0x38   : > { %p691_p6 = pnand %p689_p1, %p660_p3  ;;  %p697_p7 = scmp.lt.u32.totalorder %s688_s4, %s955_s19 }
  0x39   : > { %p696_p4 = por %p695_p5, %p694_p2 }
  0x3a   : > { %p692_p13 = pneg %p691_p6 }
  0x3b   : > { %p698_p10 = por %p697_p7, %p696_p4 }
  0x3d   : > { %p699_p12 = pnand %p698_p10, %p692_p13 }
  0x3f   : > { %702 = shalt.err (!%p699_p12)
}
  0x40   : > { %s703_s7 = scalar_lea.vmem %s957_s26, 1024  ;;  %s809_s8 = smov [#allocation6]  }
  0x41   : > { %p704_p9 = scmp.ne.s32.totalorder %s957_s26, %s703_s7  ;;  %s708_s16 = sshll.u32 %s809_s8, 4  ;;  %s709_s16 = int_to_ptr.vmem [resolvable:$false] %s708_s16 }
  0x42   : > { %s710_s18 = scalar_lea.vmem %s709_s16, 2048  ;;  %p711_p8 = scmp.lt.s32.totalorder %s957_s26, %s709_s16 }
  0x43   : > { %p706_p1 = pnand %p704_p9, %p660_p3  ;;  %p712_p2 = scmp.lt.s32.totalorder %s710_s18, %s703_s7 }
  0x45   : > { %p707_p6 = pneg %p706_p1  ;;  %p713_p5 = por %p712_p2, %p711_p8 }
  0x47   : > { %p714_p4 = pnand %p713_p5, %p707_p6 }
  0x49   : > { %717 = shalt.err (!%p714_p4)
}
  0x4a   : > { %s810_s20 = smov 64   ;;  %s811_s4 = smov 4  }
  0x4b   : > { %587 = dma.hbm_to_vmem [thread:$0]  (!%p910_p0), %s955_s19, 1024, %s957_s26, %s180_s30, %s810_s20, %s810_s20, %s811_s4  }
  0x4c   : > { %205 = sbr.rel (%p948_p11) target bundleno = 349 (0x15d), region = 28  ;;  %s988_s6 = sand.u32 (!%p948_p11), 1, %s788_s10  }
  0x4d   : > { %s527_s27 = sshll.u32 (!%p948_p11), %s988_s6, 4  ;;  %s208_s28 = scalar_lea.sflag (!%p948_p11), [#allocation4], %s988_s6 }
  0x4e   : > { %s994_s29 = scalar_lea.vmem (!%p948_p11), [#allocation3], %s527_s27  ;;  %p1077_p8 = scmp.ne.s32.totalorder (!%p948_p11), %s1071_s21, 0 }
  0x53   : > { %771 = dma.done.wait (%p1077_p8), %s208_s28, 256  }
  0x54   : > { %773 = vsyncadd (%p1077_p8), %s208_s28, 4294967040  ;;  %s528_s25 = sshll.u32 %s988_s6, 6  ;;  %s217_s5 = scalar_lea.sflag [#allocation7], %s988_s6 }
  0x55   : > { %s220_s15 = scalar_lea.vmem [#allocation6], %s528_s25 }
  0x56   : > { %775 = dma.done.wait (%p1077_p8), %s217_s5, 1024  }
  0x57   : > { %777 = vsyncadd (%p1077_p8), %s217_s5, 4294966272  ;;  %v812_v0 = vmov 0.0   ;;  %vm813_vm0 = vmmov 0   ;;  %v650_v1 = vld [vmem:[%s220_s15] sm:$0xff]   ;;  %v651_v2 = vld [vmem:[%s220_s15 + $0x8] sm:$0xff]   ;;  %s245_s21 = scalar_lea.vmem [#allocation8], %s527_s27 }
  0x58   : > { %555 = vmatprep.subr.bf16.mxu0 %v812_v0  ;;  %571 = vmatprep.mubr.msk.bf16.mxu0 %vm813_vm0, %v812_v0  ;;  %v652_v3 = vld [vmem:[%s220_s15 + $0x10] sm:$0xff]   ;;  %v653_v4 = vld [vmem:[%s220_s15 + $0x18] sm:$0xff]   ;;  %v654_v5 = vld [vmem:[%s220_s15 + $0x20] sm:$0xff]   ;;  %s394_s19 = sshll.u32 %s245_s21, 4  ;;  %s545_s26 = sshll.u32 %s796_s12, 8  ;;  %s1011_s19 = int_to_ptr.vmem [resolvable:$true] %s394_s19 }
  0x59   : > { %556 = vmatpush3.bf16.msra.mxu0 %v650_v1  ;;  %v655_v6 = vld [vmem:[%s220_s15 + $0x28] sm:$0xff]   ;;  %v656_v7 = vld [vmem:[%s220_s15 + $0x30] sm:$0xff]   ;;  %v657_v8 = vld [vmem:[%s220_s15 + $0x38] sm:$0xff]   ;;  %s1016_s7 = scalar_lea.hbm %s1067_s2, %s545_s26  ;;  %s378_s8 = scalar_lea.sflag [#allocation5], %s988_s6 }
  0x5a   : > { %557 = vmatprep.subr.bf16.mxu0 %v812_v0  ;;  %v258_v9 = vld [vmem:[%s994_s29] sm:$0xff]  ;;  %v259_v10 = vld [vmem:[%s994_s29 + $0x8] sm:$0xff]  ;;  %s718_s16 = scalar_lea.vmem %s1011_s19, 256  ;;  %p1078_p3 = scmp.ne.s32.totalorder %s1072_s22, 0 }
  0x5b   : > { %v260_v11 = vpack.c.bf16 %v259_v10, %v258_v9  ;;  %p719_p0 = scmp.ne.s32.totalorder %s1011_s19, %s718_s16  ;;  %s814_s12 = smov [#allocation8]  }
  0x5c   : > { %s722_s18 = sshll.u32 %s814_s12, 4  ;;  %s723_s18 = int_to_ptr.vmem [resolvable:$false] %s722_s18 }
  0x5d   : > { %558 = vmatpush3.bf16.msra.mxu0 %v651_v2  ;;  %p720_p11 = pnand %p719_p0, %p1078_p3  ;;  %s724_s20 = scalar_lea.vmem %s723_s18, 512 }
  0x5e   : > { %559 = vmatprep.subr.bf16.mxu0 %v812_v0  ;;  %p725_p7 = scmp.lt.s32.totalorder %s1011_s19, %s723_s18  ;;  %p726_p10 = scmp.lt.s32.totalorder %s724_s20, %s718_s16 }
  0x5f   : > { %p721_p13 = pneg %p720_p11 }
  0x60   : > { %p727_p12 = por %p726_p10, %p725_p7 }
  0x61   : > { %560 = vmatpush3.bf16.msra.mxu0 %v652_v3 }
  0x62   : > { %561 = vmatprep.subr.bf16.mxu0 %v812_v0  ;;  %p728_p9 = pnand %p727_p12, %p721_p13 }
  0x65   : > { %562 = vmatpush3.bf16.msra.mxu0 %v653_v4 }
  0x66   : > { %563 = vmatprep.subr.bf16.mxu0 %v812_v0 }
  0x69   : > { %564 = vmatpush3.bf16.msra.mxu0 %v654_v5 }
  0x6a   : > { %565 = vmatprep.subr.bf16.mxu0 %v812_v0 }
  0x6d   : > { %566 = vmatpush3.bf16.msra.mxu0 %v655_v6 }
  0x6e   : > { %567 = vmatprep.subr.bf16.mxu0 %v812_v0 }
  0x71   : > { %568 = vmatpush3.bf16.msra.mxu0 %v656_v7 }
  0x72   : > { %569 = vmatprep.subr.bf16.mxu0 %v812_v0 }
  0x75   : > { %570 = vmatpush3.bf16.msra.mxu0 %v657_v8 }
  0x78   : > { %572 = vmatmul.mubr.bf16.vlgmr.msra.gmra.mrb[0].mxu0 %v260_v11 }
 0x14b   : > { %v359_v12 = vpop.f32.mrb[0].mxu0 }
 0x14c   : > { %375 = vst [vmem:[%s245_s21] sm:$0xff] %v359_v12  ;;  %v573_v13 = vpop.f32.mrb[1].mxu0 }
 0x14d   : > { %v362_v14 = vpop.f32.mrb[2].mxu0 }
 0x14e   : > { %376 = vst [vmem:[%s245_s21 + $0x8] sm:$0xff] %v362_v14  ;;  %v574_v15 = vpop.f32.mrb[3].mxu0 }
 0x14f   : > { %731 = shalt.err (!%p728_p9)
}
 0x150   : > { %s732_s4 = scalar_lea.hbm %s1016_s7, 256  ;;  %s736_s29 = scalar_lea.hbm %s1067_s2, 512 }
 0x151   : > { %p733_p1 = scmp.ne.s32.totalorder %s1016_s7, %s732_s4  ;;  %p737_p5 = scmp.lt.u32.totalorder %s1016_s7, %s1067_s2 }
 0x152   : > { %p738_p4 = scmp.lt.u32.totalorder %s736_s29, %s732_s4  ;;  %p740_p0 = scmp.lt.u32.totalorder %s732_s4, %s1016_s7 }
 0x153   : > { %p734_p6 = pnand %p733_p1, %p1078_p3 }
 0x154   : > { %p739_p8 = por %p738_p4, %p737_p5 }
 0x155   : > { %p735_p2 = pneg %p734_p6 }
 0x156   : > { %p741_p11 = por %p740_p0, %p739_p8 }
 0x158   : > { %p742_p13 = pnand %p741_p11, %p735_p2 }
 0x15a   : > { %745 = shalt.err (!%p742_p13)
}
 0x15b   : > { %s815_s15 = smov 128   ;;  %s816_s21 = smov 8  }
 0x15c   : > { %579 = dma.vmem_to_hbm [thread:$0]  (%p1078_p3), %s1011_s19, 256, %s1016_s7, %s378_s8, %s815_s15, %s815_s15, %s816_s21  }
 0x15d PF: > { %s409_s26 = sand.u32 1, %s784_s9   ;;  %p1079_p7 = scmp.ne.s32.totalorder %s1073_s24, 0 }
 0x15e   : > { %p1080_p10 = scmp.ge.s32.totalorder %s804_s14, 2  ;;  %s410_s30 = scalar_lea.sflag [#allocation5], %s409_s26 }
 0x160   : > { %p589_p12 = pnand %p1080_p10, %p1079_p7 }
 0x162   : > { %779 = dma.done.wait (!%p589_p12), %s410_s30, 256  }
 0x163   : > { %781 = vsyncadd (!%p589_p12), %s410_s30, 4294967040  ;;  %s21_s14 = sadd.s32 1, %s804_s14   ;;  %s1081_s9 = smov %s788_s10 }
 0x164   : > { %p18_p9 = scmp.ge.s32.totalorder %s21_s14, 4   ;;  %s1082_s10 = smov %s792_s11 }
 0x165   : > { %s1083_s11 = smov %s888_s23  ;;  %s1084_s12 = smov %s800_s13 }
 0x166   : > { %s1085_s13 = smov %s1087_s17  ;;  %20 = sbr.rel (!%p18_p9) target bundleno = 8 (0x8), region = 94 }
 0x16d   :  { %415 = vsyncpa [#allocation4], 1 }
 0x16e   :  { %417 = vsyncpa [#allocation4 + $0x1], 1 }
 0x16f   :  { %418 = vsyncpa [#allocation7], 1 }
 0x170   :  { %420 = vsyncpa [#allocation7 + $0x1], 1 }
 0x171   :  { %421 = vsyncpa [#allocation5], 1 }
 0x172   :  { %423 = vsyncpa [#allocation5 + $0x1], 1 }

</bundles_post_ra>
